<compile_context>
chip_gen: v7x
topology: tpu7x:2x2x1
jax: 0.10.0
libtpu: 0.0.40
codegen_flags: <defaults>
</compile_context>

<pallas_src>
import functools

import jax
import jax.numpy as jnp
from jax.experimental import pallas as pl
from jax.experimental.pallas import tpu as pltpu

IGNORE_INDEX_DEFAULT = -100


def _round_up(x, m):
    return -(-x // m) * m


def _ce_kernel(*refs, ignore_index, hw, tile_s, n_inner, weighted, ragged,
               compute_dtype):
    if weighted:
        (logits_ref, targets_ref, weights_ref,
         loss_ref, wsum_ref, loss_acc, wsum_acc) = refs
    else:
        (logits_ref, targets_ref,
         loss_ref, wsum_ref, loss_acc, wsum_acc) = refs
        weights_ref = None

    so = pl.program_id(1)          # parallel spatial-group axis
    si = pl.program_id(2)          # reduction axis (innermost)

    @pl.when(si == 0)
    def _():
        loss_acc[...] = jnp.zeros_like(loss_acc)
        wsum_acc[...] = jnp.zeros_like(wsum_acc)

    x = logits_ref[...].astype(compute_dtype)     # (C, TS) classes on sublanes
    t = targets_ref[...]                          # (1, TS) int32

    C = x.shape[0]
    # (C,1) iota; the == does the lane broadcast (no (C,TS) iota materialized).
    cls = jax.lax.broadcasted_iota(jnp.int32, (C, 1), 0)
    tgt_mask = cls == t                           # (C, TS)

    # numerically-stable logsumexp over classes (sublane reduce)
    m = jnp.max(x, axis=0, keepdims=True)         # (1, TS)
    xm = x - m                                    # (C, TS); raw upcast dies here
    e = jnp.exp(xm)                               # EUP
    sumexp = jnp.sum(e.astype(jnp.float32), axis=0, keepdims=True)
    log_sumexp = jnp.log(sumexp)                  # (1, TS) f32

    # loss per element = logsumexp - x_t = log(sum exp(x-m)) - (x_t - m)
    if weighted:
        w = weights_ref[...].astype(jnp.float32)              # (C, 1)
        masked_w = jnp.where(tgt_mask, w, 0.0)                # (C, TS)
        w_elem = jnp.sum(masked_w, axis=0, keepdims=True)     # (1, TS)
        wxm = jnp.sum(masked_w * xm.astype(jnp.float32),
                      axis=0, keepdims=True)                  # (1, TS)
        loss_elem = w_elem * log_sumexp - wxm
    else:
        zero = jnp.zeros((), compute_dtype)
        tgt_xm = jnp.sum(jnp.where(tgt_mask, xm, zero).astype(jnp.float32),
                         axis=0, keepdims=True)               # (1, TS)
        loss_elem = log_sumexp - tgt_xm
        w_elem = jnp.ones_like(loss_elem)

    ign_ok = t != ignore_index                                # (1, TS)

    def _accumulate(valid):
        loss_acc[...] += jnp.where(valid, loss_elem, 0.0)
        wsum_acc[...] += jnp.where(valid, w_elem, 0.0)

    if ragged:
        # Only the globally-last spatial tile has out-of-range lanes; the
        # column mask (iota + compare) only runs there.
        is_tail = jnp.logical_and(so == pl.num_programs(1) - 1,
                                  si == pl.num_programs(2) - 1)

        @pl.when(is_tail)
        def _():
            col = (jax.lax.broadcasted_iota(jnp.int32, t.shape, 1)
                   + (so * n_inner + si) * tile_s)
            _accumulate(jnp.logical_and(ign_ok, col < hw))

        @pl.when(jnp.logical_not(is_tail))
        def _():
            _accumulate(ign_ok)
    else:
        _accumulate(ign_ok)

    # cross-lane reduce + tiny store only on the final reduction step
    @pl.when(si == pl.num_programs(2) - 1)
    def _():
        loss_ref[...] = jnp.sum(loss_acc[...], keepdims=True)
        wsum_ref[...] = jnp.sum(wsum_acc[...], keepdims=True)


def cross_entropy_loss(inputs, targets, class_weights=None,
                       ignore_index=IGNORE_INDEX_DEFAULT,
                       compute_dtype=None):
    """inputs: (N, C, H, W) float logits; targets: (N, H, W) int class ids."""
    N, C, H, W = inputs.shape
    HW = H * W

    # Lane-dense layout with zero wrapper-side data movement: contiguous NCHW
    # reshape puts flattened H*W on lanes and classes on sublanes.
    logits = inputs.reshape(N, C, HW)
    tgt = targets.reshape(N, 1, HW).astype(jnp.int32)

    weighted = class_weights is not None
    if weighted:
        w = jnp.asarray(class_weights, jnp.float32).reshape(C, 1)

    # bf16 inputs: keep the VPU/EUP math in bf16 (v6e/v7x are bf16-native).
    # On v5e (no bf16 VALU/EUP) callers should pass compute_dtype=jnp.float32.
    if compute_dtype is None:
        compute_dtype = (jnp.bfloat16 if inputs.dtype == jnp.bfloat16
                         else jnp.float32)

    # ---- VMEM budgeting (derived from the actual chip) ----------------------
    try:
        vmem_cap = int(pltpu.get_tpu_info().vmem_capacity_bytes)
    except Exception:
        vmem_cap = 64 * 1024 * 1024        # conservative (v7x per-TC)
    vmem_limit = (3 * vmem_cap) // 4        # headroom for Mosaic scratch
    vmem_budget = (2 * vmem_cap) // 5       # budget for data tiles + temporaries

    in_isize = jnp.dtype(inputs.dtype).itemsize
    cp_isize = jnp.dtype(compute_dtype).itemsize
    c_pad_in = _round_up(C, max(1, 32 // in_isize))   # sublane pack of input dtype
    c_pad_cp = _round_up(C, max(1, 32 // cp_isize))   # sublane pack of compute dtype
    c_pad_f32 = _round_up(C, 8)
    per_lane = (2 * c_pad_in * in_isize        # double-buffered logits blocks
                + 4 * c_pad_cp * cp_isize      # (C,TS) temporaries: x, x-m, exp, select
                + c_pad_f32 * 4                # f32 cast feeding the class sums
                + 2 * 8 * 4                    # double-buffered int32 targets (8-sublane pad)
                + 2 * 8 * 4                    # two f32 lane-wide accumulators
                + 8 * 8 * 4)                   # (1,TS) row temporaries (m, lse, sums, masks)
    max_tile_s = max(128, (vmem_budget // per_lane) // 128 * 128)
    tile_s = HW if HW <= max_tile_s else max_tile_s
    # TODO(synk): for very large C (LM-vocab scale) add a class-axis grid
    # dimension with an online (flash-style) running max / sum-of-exp instead
    # of loading all C classes per spatial tile.
    n_s = pl.cdiv(HW, tile_s)
    ragged = (HW % tile_s) != 0

    # v7x megacore: if the batch axis alone can't feed both TensorCores,
    # expose a second parallel axis over groups of spatial tiles.
    if N >= 2 or n_s < 2 or (n_s % 2) != 0:
        n_outer = 1
    else:
        n_outer = 2
    n_inner = n_s // n_outer

    kernel = functools.partial(
        _ce_kernel, ignore_index=ignore_index, hw=HW, tile_s=tile_s,
        n_inner=n_inner, weighted=weighted, ragged=ragged,
        compute_dtype=compute_dtype)

    in_specs = [
        pl.BlockSpec((None, C, tile_s),
                     lambda n, so, si: (n, 0, so * n_inner + si)),   # logits
        pl.BlockSpec((None, 1, tile_s),
                     lambda n, so, si: (n, 0, so * n_inner + si)),   # targets
    ]
    operands = [logits, tgt]
    if weighted:
        in_specs.append(pl.BlockSpec((C, 1), lambda n, so, si: (0, 0)))
        operands.append(w)

    out_specs = [
        pl.BlockSpec((None, 1, 1), lambda n, so, si: (n * n_outer + so, 0, 0)),
        pl.BlockSpec((None, 1, 1), lambda n, so, si: (n * n_outer + so, 0, 0)),
    ]

    loss_part, wsum_part = pl.pallas_call(
        kernel,
        out_shape=(jax.ShapeDtypeStruct((N * n_outer, 1, 1), jnp.float32),
                   jax.ShapeDtypeStruct((N * n_outer, 1, 1), jnp.float32)),
        grid_spec=pltpu.PrefetchScalarGridSpec(
            num_scalar_prefetch=0,
            grid=(N, n_outer, n_inner),
            in_specs=in_specs,
            out_specs=out_specs,
            scratch_shapes=[pltpu.VMEM((1, tile_s), jnp.float32),
                            pltpu.VMEM((1, tile_s), jnp.float32)],
        ),
        compiler_params=pltpu.CompilerParams(
            dimension_semantics=("parallel", "parallel", "arbitrary"),
            vmem_limit_bytes=vmem_limit),
    )(*operands)

    # NaN if every target is ignored (0/0), matching PyTorch's behaviour.
    return jnp.sum(loss_part) / jnp.sum(wsum_part)


def _reference(inputs, targets):
    # pure-JAX reference of default nn.CrossEntropyLoss()
    N, C, H, W = inputs.shape
    x = jnp.transpose(inputs, (0, 2, 3, 1)).reshape(-1, C).astype(jnp.float32)
    t = targets.reshape(-1)
    lse = jax.nn.logsumexp(x, axis=-1)
    tgt = jnp.take_along_axis(x, t[:, None], axis=-1)[:, 0]
    return jnp.mean(lse - tgt)


def _reference_weighted(inputs, targets, weights, ignore_index):
    # pure-JAX reference of nn.CrossEntropyLoss(weight=..., ignore_index=...)
    N, C, H, W = inputs.shape
    x = jnp.transpose(inputs, (0, 2, 3, 1)).reshape(-1, C).astype(jnp.float32)
    t = targets.reshape(-1)
    valid = (t != ignore_index).astype(jnp.float32)
    t_safe = jnp.where(t != ignore_index, t, 0)
    lse = jax.nn.logsumexp(x, axis=-1)
    tgt = jnp.take_along_axis(x, t_safe[:, None], axis=-1)[:, 0]
    wt = weights[t_safe] * valid
    return jnp.sum(wt * (lse - tgt)) / jnp.sum(wt)


if __name__ == "__main__":
    key = jax.random.PRNGKey(0)
    k1, k2, k3 = jax.random.split(key, 3)

    N, C, H, W = 2, 4, 16, 16
    inputs = jax.random.normal(k1, (N, C, H, W), dtype=jnp.float32)
    targets = jax.random.randint(k2, (N, H, W), 0, C, dtype=jnp.int32)

    # config=None path: plain mean-reduced cross-entropy
    loss = jax.block_until_ready(cross_entropy_loss(inputs, targets))
    ref = jax.block_until_ready(_reference(inputs, targets))
    assert jnp.allclose(loss, ref, atol=1e-5, rtol=1e-5), (loss, ref)

    # config path: class weights + ignore_index
    cw = jax.random.uniform(k3, (C,), jnp.float32, 0.5, 2.0)
    tgt_ig = targets.at[0, 0, :4].set(IGNORE_INDEX_DEFAULT)
    loss_w = jax.block_until_ready(
        cross_entropy_loss(inputs, tgt_ig, class_weights=cw,
                           ignore_index=IGNORE_INDEX_DEFAULT))
    ref_w = jax.block_until_ready(
        _reference_weighted(inputs, tgt_ig, cw, IGNORE_INDEX_DEFAULT))
    assert jnp.allclose(loss_w, ref_w, atol=1e-5, rtol=1e-5), (loss_w, ref_w)

    print("KERNEL_OK")
</pallas_src>

<mosaic_0001>
module attributes {stable_mosaic.version = 11 : i64} {
  func.func @_ce_kernel(%arg0: i32, %arg1: i32, %arg2: i32, %arg3: memref<1x4x256xf32, #tpu.memory_space<vmem>>, %arg4: memref<1x1x256xi32, #tpu.memory_space<vmem>>, %arg5: memref<1x1x1xf32, #tpu.memory_space<vmem>>, %arg6: memref<1x1x1xf32, #tpu.memory_space<vmem>>, %arg7: memref<1x256xf32, #tpu.memory_space<vmem>>, %arg8: memref<1x256xf32, #tpu.memory_space<vmem>>) attributes {dimension_semantics = [#tpu.dimension_semantics<parallel>, #tpu.dimension_semantics<parallel>, #tpu.dimension_semantics<arbitrary>], iteration_bounds = array<i64: 2, 1, 1>, scalar_prefetch = 0 : i64, scratch_operands = 2 : i64, tpu.core_type = #tpu.core_type<tc>, window_params = [{transform_indices = @transform_0, window_bounds = array<i64: 1, 4, 256>}, {transform_indices = @transform_1, window_bounds = array<i64: 1, 1, 256>}, {transform_indices = @transform_2, window_bounds = array<i64: 1, 1, 1>}, {transform_indices = @transform_3, window_bounds = array<i64: 1, 1, 1>}]} {
    %c0_i32 = arith.constant 0 : i32
    %0 = arith.cmpi eq, %arg2, %c0_i32 : i32
    %1 = arith.extui %0 : i1 to i32
    %c0_i32_0 = arith.constant 0 : i32
    %2 = arith.cmpi ne, %1, %c0_i32_0 : i32
    scf.if %2 {
      %cst_22 = arith.constant 0.000000e+00 : f32
      %40 = vector.broadcast %cst_22 : f32 to vector<1x256xf32>
      %c0_23 = arith.constant 0 : index
      %c0_24 = arith.constant 0 : index
      %41 = vector.load %arg7[%c0_23, %c0_24] : memref<1x256xf32, #tpu.memory_space<vmem>>, vector<1x256xf32>
      tpu.vector_store %arg7[%c0_23, %c0_24], %40 {strides = array<i32>} : memref<1x256xf32, #tpu.memory_space<vmem>>, vector<1x256xf32>,
      %cst_25 = arith.constant 0.000000e+00 : f32
      %42 = vector.broadcast %cst_25 : f32 to vector<1x256xf32>
      %c0_26 = arith.constant 0 : index
      %c0_27 = arith.constant 0 : index
      %43 = vector.load %arg8[%c0_26, %c0_27] : memref<1x256xf32, #tpu.memory_space<vmem>>, vector<1x256xf32>
      tpu.vector_store %arg8[%c0_26, %c0_27], %42 {strides = array<i32>} : memref<1x256xf32, #tpu.memory_space<vmem>>, vector<1x256xf32>,
    } else {
    }
    %c0 = arith.constant 0 : index
    %c0_1 = arith.constant 0 : index
    %c0_2 = arith.constant 0 : index
    %3 = vector.load %arg3[%c0, %c0_1, %c0_2] : memref<1x4x256xf32, #tpu.memory_space<vmem>>, vector<1x4x256xf32>
    %4 = vector.shape_cast %3 : vector<1x4x256xf32> to vector<4x256xf32>
    %c0_3 = arith.constant 0 : index
    %c0_4 = arith.constant 0 : index
    %c0_5 = arith.constant 0 : index
    %5 = vector.load %arg4[%c0_3, %c0_4, %c0_5] : memref<1x1x256xi32, #tpu.memory_space<vmem>>, vector<1x1x256xi32>
    %6 = vector.shape_cast %5 : vector<1x1x256xi32> to vector<1x256xi32>
    %7 = tpu.iota {dimensions = array<i32: 0>} : vector<4x1xi32>
    %8 = vector.broadcast %7 : vector<4x1xi32> to vector<4x256xi32>
    %9 = vector.broadcast %6 : vector<1x256xi32> to vector<4x256xi32>
    %10 = arith.cmpi eq, %8, %9 : vector<4x256xi32>
    %cst = arith.constant dense<0xFF800000> : vector<256xf32>
    %11 = vector.multi_reduction <maximumf>, %4, %cst [0] : vector<4x256xf32> to vector<256xf32>
    %12 = vector.shape_cast %11 : vector<256xf32> to vector<1x256xf32>
    %13 = vector.broadcast %12 : vector<1x256xf32> to vector<4x256xf32>
    %14 = arith.subf %4, %13 : vector<4x256xf32>
    %15 = math.exp %14 : vector<4x256xf32>
    %cst_6 = arith.constant dense<0.000000e+00> : vector<256xf32>
    %16 = vector.multi_reduction <add>, %15, %cst_6 [0] : vector<4x256xf32> to vector<256xf32>
    %17 = vector.shape_cast %16 : vector<256xf32> to vector<1x256xf32>
    %18 = math.log %17 : vector<1x256xf32>
    %cst_7 = arith.constant 0.000000e+00 : f32
    %19 = vector.broadcast %cst_7 : f32 to vector<4x256xf32>
    %20 = arith.select %10, %14, %19 : vector<4x256xi1>, vector<4x256xf32>
    %cst_8 = arith.constant dense<0.000000e+00> : vector<256xf32>
    %21 = vector.multi_reduction <add>, %20, %cst_8 [0] : vector<4x256xf32> to vector<256xf32>
    %22 = vector.shape_cast %21 : vector<256xf32> to vector<1x256xf32>
    %23 = arith.subf %18, %22 : vector<1x256xf32>
    %cst_9 = arith.constant 1.000000e+00 : f32
    %24 = vector.broadcast %cst_9 : f32 to vector<1x256xf32>
    %c-100_i32 = arith.constant -100 : i32
    %25 = vector.broadcast %c-100_i32 : i32 to vector<1x256xi32>
    %26 = arith.cmpi ne, %6, %25 : vector<1x256xi32>
    %c0_10 = arith.constant 0 : index
    %c0_11 = arith.constant 0 : index
    %27 = vector.load %arg7[%c0_10, %c0_11] : memref<1x256xf32, #tpu.memory_space<vmem>>, vector<1x256xf32>
    %cst_12 = arith.constant 0.000000e+00 : f32
    %28 = vector.broadcast %cst_12 : f32 to vector<1x256xf32>
    %29 = arith.select %26, %23, %28 : vector<1x256xi1>, vector<1x256xf32>
    %30 = arith.addf %27, %29 : vector<1x256xf32>
    %c0_13 = arith.constant 0 : index
    %c0_14 = arith.constant 0 : index
    %31 = vector.load %arg7[%c0_13, %c0_14] : memref<1x256xf32, #tpu.memory_space<vmem>>, vector<1x256xf32>
    tpu.vector_store %arg7[%c0_13, %c0_14], %30 {strides = array<i32>} : memref<1x256xf32, #tpu.memory_space<vmem>>, vector<1x256xf32>,
    %c0_15 = arith.constant 0 : index
    %c0_16 = arith.constant 0 : index
    %32 = vector.load %arg8[%c0_15, %c0_16] : memref<1x256xf32, #tpu.memory_space<vmem>>, vector<1x256xf32>
    %cst_17 = arith.constant 0.000000e+00 : f32
    %33 = vector.broadcast %cst_17 : f32 to vector<1x256xf32>
    %34 = arith.select %26, %24, %33 : vector<1x256xi1>, vector<1x256xf32>
    %35 = arith.addf %32, %34 : vector<1x256xf32>
    %c0_18 = arith.constant 0 : index
    %c0_19 = arith.constant 0 : index
    %36 = vector.load %arg8[%c0_18, %c0_19] : memref<1x256xf32, #tpu.memory_space<vmem>>, vector<1x256xf32>
    tpu.vector_store %arg8[%c0_18, %c0_19], %35 {strides = array<i32>} : memref<1x256xf32, #tpu.memory_space<vmem>>, vector<1x256xf32>,
    %c0_i32_20 = arith.constant 0 : i32
    %37 = arith.cmpi eq, %arg2, %c0_i32_20 : i32
    %38 = arith.extui %37 : i1 to i32
    %c0_i32_21 = arith.constant 0 : i32
    %39 = arith.cmpi ne, %38, %c0_i32_21 : i32
    scf.if %39 {
      %c0_22 = arith.constant 0 : index
      %c0_23 = arith.constant 0 : index
      %40 = vector.load %arg7[%c0_22, %c0_23] : memref<1x256xf32, #tpu.memory_space<vmem>>, vector<1x256xf32>
      %41 = vector.shape_cast %40 : vector<1x256xf32> to vector<1x1x256xf32>
      %cst_24 = arith.constant dense<0.000000e+00> : vector<1xf32>
      %42 = vector.multi_reduction <add>, %41, %cst_24 [1, 2] : vector<1x1x256xf32> to vector<1xf32>
      %43 = vector.shape_cast %42 : vector<1xf32> to vector<1x1x1xf32>
      %44 = vector.extract %43[0, 0, 0] : f32 from vector<1x1x1xf32>
      %45 = vector.broadcast %44 : f32 to vector<1x1xf32>
      %c0_25 = arith.constant 0 : index
      %c0_26 = arith.constant 0 : index
      %c0_27 = arith.constant 0 : index
      %46 = vector.load %arg5[%c0_25, %c0_26, %c0_27] : memref<1x1x1xf32, #tpu.memory_space<vmem>>, vector<1x1x1xf32>
      %47 = vector.shape_cast %46 : vector<1x1x1xf32> to vector<1x1xf32>
      %48 = vector.shape_cast %45 : vector<1x1xf32> to vector<1x1x1xf32>
      tpu.vector_store %arg5[%c0_25, %c0_26, %c0_27], %48 {strides = array<i32>} : memref<1x1x1xf32, #tpu.memory_space<vmem>>, vector<1x1x1xf32>,
      %c0_28 = arith.constant 0 : index
      %c0_29 = arith.constant 0 : index
      %49 = vector.load %arg8[%c0_28, %c0_29] : memref<1x256xf32, #tpu.memory_space<vmem>>, vector<1x256xf32>
      %50 = vector.shape_cast %49 : vector<1x256xf32> to vector<1x1x256xf32>
      %cst_30 = arith.constant dense<0.000000e+00> : vector<1xf32>
      %51 = vector.multi_reduction <add>, %50, %cst_30 [1, 2] : vector<1x1x256xf32> to vector<1xf32>
      %52 = vector.shape_cast %51 : vector<1xf32> to vector<1x1x1xf32>
      %53 = vector.extract %52[0, 0, 0] : f32 from vector<1x1x1xf32>
      %54 = vector.broadcast %53 : f32 to vector<1x1xf32>
      %c0_31 = arith.constant 0 : index
      %c0_32 = arith.constant 0 : index
      %c0_33 = arith.constant 0 : index
      %55 = vector.load %arg6[%c0_31, %c0_32, %c0_33] : memref<1x1x1xf32, #tpu.memory_space<vmem>>, vector<1x1x1xf32>
      %56 = vector.shape_cast %55 : vector<1x1x1xf32> to vector<1x1xf32>
      %57 = vector.shape_cast %54 : vector<1x1xf32> to vector<1x1x1xf32>
      tpu.vector_store %arg6[%c0_31, %c0_32, %c0_33], %57 {strides = array<i32>} : memref<1x1x1xf32, #tpu.memory_space<vmem>>, vector<1x1x1xf32>,
    } else {
    }
    return
  }
  func.func @transform_0(%arg0: i32, %arg1: i32, %arg2: i32) -> (i32, i32, i32) {
    %c1_i32 = arith.constant 1 : i32
    %0 = arith.muli %arg1, %c1_i32 : i32
    %1 = arith.addi %0, %arg2 : i32
    %c0_i32 = arith.constant 0 : i32
    %c0_i32_0 = arith.constant 0 : i32
    return %arg0, %c0_i32, %1 : i32, i32, i32
  }
  func.func @transform_1(%arg0: i32, %arg1: i32, %arg2: i32) -> (i32, i32, i32) {
    %c1_i32 = arith.constant 1 : i32
    %0 = arith.muli %arg1, %c1_i32 : i32
    %1 = arith.addi %0, %arg2 : i32
    %c0_i32 = arith.constant 0 : i32
    %c0_i32_0 = arith.constant 0 : i32
    return %arg0, %c0_i32, %1 : i32, i32, i32
  }
  func.func @transform_2(%arg0: i32, %arg1: i32, %arg2: i32) -> (i32, i32, i32) {
    %c1_i32 = arith.constant 1 : i32
    %0 = arith.muli %arg0, %c1_i32 : i32
    %1 = arith.addi %0, %arg1 : i32
    %c0_i32 = arith.constant 0 : i32
    %c0_i32_0 = arith.constant 0 : i32
    %c0_i32_1 = arith.constant 0 : i32
    return %1, %c0_i32, %c0_i32_0 : i32, i32, i32
  }
  func.func @transform_3(%arg0: i32, %arg1: i32, %arg2: i32) -> (i32, i32, i32) {
    %c1_i32 = arith.constant 1 : i32
    %0 = arith.muli %arg0, %c1_i32 : i32
    %1 = arith.addi %0, %arg1 : i32
    %c0_i32 = arith.constant 0 : i32
    %c0_i32_0 = arith.constant 0 : i32
    %c0_i32_1 = arith.constant 0 : i32
    return %1, %c0_i32, %c0_i32_0 : i32, i32, i32
  }
}

</mosaic_0001>

<bundles_post_ra>
// kernel: tpu_custom_call.1
= control target key start
LH: loop header
LB: loop body
LE: loop exit
PB: predicated region body
PF: predicated region fallthrough
CT: control target
= control target key end

     0   :  { %9 = vsyncpa [#allocation5], 0  ;;  %s1026_s0 = inlined_call_operand.hbm [shape: f32[2,4,256], index: 0, kind: input, shape index: {}]   ;;  %s1027_s1 = inlined_call_operand.hbm [shape: s32[2,1,256], index: 1, kind: input, shape index: {}]   ;;  %s1028_s2 = inlined_call_operand.vmem [shape: f32[2,1,1], index: 2, kind: output, shape index: {0}]   ;;  %s1029_s3 = inlined_call_operand.vmem [shape: f32[2,1,1], index: 3, kind: output, shape index: {1}]  }
   0x1   :  { %11 = vsyncpa [#allocation5 + $0x1], 0 }
   0x2   :  { %12 = vsyncpa [#allocation7], 0 }
   0x3   :  { %14 = vsyncpa [#allocation7 + $0x1], 0  ;;  %s820_s12 = smov 0   ;;  %s822_s13 = smov 0  }
   0x4   :  { %s824_s14 = smov 0   ;;  %s826_s15 = smov 0  }
   0x5   :  { %s828_s16 = smov 0   ;;  %s830_s17 = smov 0  }
   0x6 LB: > { %s590_s18 = sadd.s32 4294967295, %s794_s17   ;;  %s39_s19 = sadd.s32 1, %s790_s16  ;;  %s794_s17 = sphi %s830_s17, %s20_s17   ;;  %s790_s16 = sphi %s828_s16, %s1045_s16   ;;  %s786_s15 = sphi %s826_s15, %s1044_s15   ;;  %s782_s14 = sphi %s824_s14, %s1043_s14   ;;  %s778_s13 = sphi %s822_s13, %s1042_s13   ;;  %s774_s12 = sphi %s820_s12, %s1041_s12  }
   0x7   : > { %p41_p0 = scmp.ge.s32.totalorder %s39_s19, 2  ;;  %s50_s20 = sadd.s32 1, %s782_s14 }
   0x8   : > { %p57_p1 = scmp.ne.s32.totalorder %s782_s14, %s778_s13  ;;  %p58_p2 = scmp.eq.s32.totalorder %s794_s17, 0 }
   0x9   : > { %s1047_s19 = smov (%p41_p0, %s39_s19), 0  ;;  %p63_p4 = scmp.ne.s32.totalorder %s778_s13, %s774_s12 }
   0xa   : > { %p856_p3 = por %p58_p2, %p57_p1  ;;  %s45_s22 = ssub.s32 %s790_s16, %s1047_s19 }
   0xb   : > { %p64_p5 = scmp.eq.s32.totalorder %s590_s18, 0  ;;  %p48_p6 = scmp.eq.s32.totalorder %s45_s22, 0 }
   0xc   : > { %p622_p8 = scmp.lt.s32.totalorder %s794_s17, 2  ;;  %s872_s25 = sand.u32 1, %s782_s14  }
   0xd   : > { %p863_p7 = por %p64_p5, %p63_p4  ;;  %s605_s26 = sshll.u32 %s790_s16, 7 }
   0xe   : > { %s869_s24 = scalar_select %p48_p6, %s782_s14, %s50_s20  }
   0xf   : > { %s1032_s23 = scalar_select %p863_p7, 1, 0 }
  0x10   : > { %s594_s27 = sshll.u32 %s872_s25, 3  ;;  %s879_s30 = scalar_lea.hbm %s1026_s0, %s605_s26 }
  0x11   : > { %s177_s4 = scalar_lea.vmem [#allocation4], %s594_s27  ;;  %p883_p9 = pnand %p622_p8, %p856_p3 }
  0x12   : > { %s188_s5 = sshll.u32 %s177_s4, 4  ;;  %s174_s7 = scalar_lea.sflag [#allocation5], %s872_s25  ;;  %s887_s5 = int_to_ptr.vmem [resolvable:$true] %s188_s5 }
  0x13   : > { %s680_s8 = scalar_lea.hbm %s879_s30, 128  ;;  %p682_p13 = pneg %p883_p9 }
  0x14   : > { %p681_p12 = scmp.ne.s32.totalorder %s879_s30, %s680_s8  ;;  %s685_s11 = scalar_lea.hbm %s1026_s0, 256 }
  0x15   : > { %p686_p2 = scmp.lt.u32.totalorder %s879_s30, %s1026_s0  ;;  %p687_p3 = scmp.lt.u32.totalorder %s685_s11, %s680_s8 }
  0x16   : > { %p683_p0 = pnand %p682_p13, %p681_p12  ;;  %p689_p5 = scmp.lt.u32.totalorder %s680_s8, %s879_s30 }
  0x17   : > { %p688_p4 = por %p687_p3, %p686_p2 }
  0x18   : > { %p684_p1 = pneg %p683_p0 }
  0x19   : > { %p690_p6 = por %p689_p5, %p688_p4 }
  0x1b   : > { %p691_p8 = pnand %p690_p6, %p684_p1 }
  0x1d   : > { %694 = shalt.err (!%p691_p8)
}
  0x1e   : > { %s695_s20 = scalar_lea.vmem %s887_s5, 128  ;;  %s796_s21 = smov [#allocation4]  }
  0x1f   : > { %p696_p12 = scmp.ne.s32.totalorder %s887_s5, %s695_s20  ;;  %s700_s22 = sshll.u32 %s796_s21, 4  ;;  %s701_s22 = int_to_ptr.vmem [resolvable:$false] %s700_s22 }
  0x20   : > { %s702_s26 = scalar_lea.vmem %s701_s22, 256  ;;  %p703_p11 = scmp.lt.s32.totalorder %s887_s5, %s701_s22 }
  0x21   : > { %p698_p0 = pnand %p696_p12, %p682_p13  ;;  %p704_p2 = scmp.lt.s32.totalorder %s702_s26, %s695_s20 }
  0x23   : > { %p699_p10 = pneg %p698_p0  ;;  %p705_p3 = por %p704_p2, %p703_p11 }
  0x25   : > { %p706_p4 = pnand %p705_p3, %p699_p10 }
  0x27   : > { %709 = shalt.err (!%p706_p4)
}
  0x28   : > { %618 = dma.hbm_to_vmem [thread:$0]  (!%p883_p9), %s879_s30, 128, %s887_s5, %s174_s7  }
  0x29   : > { %p1034_p1 = scmp.lt.s32.totalorder %s794_s17, 3  ;;  %p1035_p5 = scmp.ge.s32.totalorder %s794_s17, 1 }
  0x2a   : > { %s597_s28 = sshll.u32 %s872_s25, 1  ;;  %s606_s29 = sshll.u32 %s790_s16, 5 }
  0x2b   : > { %p921_p6 = pnand %p1035_p5, %p1034_p1  ;;  %s930_s9 = scalar_lea.hbm %s1027_s1, %s606_s29 }
  0x2c   : > { %s199_s10 = scalar_lea.vmem [#allocation6], %s597_s28  ;;  %s196_s30 = scalar_lea.sflag [#allocation7], %s872_s25 }
  0x2d   : > { %s1036_s27 = scalar_select %p921_p6, 1, 0 }
  0x2e   : > { %s210_s11 = sshll.u32 %s199_s10, 4  ;;  %s710_s5 = scalar_lea.hbm %s930_s9, 32  ;;  %s211_s11 = int_to_ptr.vmem [resolvable:$true] %s210_s11 }
  0x2f   : > { %p711_p10 = scmp.ne.s32.totalorder %s930_s9, %s710_s5  ;;  %s715_s18 = scalar_lea.hbm %s1027_s1, 64 }
  0x30   : > { %p716_p12 = scmp.lt.u32.totalorder %s930_s9, %s1027_s1  ;;  %p717_p0 = scmp.lt.u32.totalorder %s715_s18, %s710_s5 }
  0x31   : > { %p713_p11 = pnand %p711_p10, %p682_p13  ;;  %p719_p3 = scmp.lt.u32.totalorder %s710_s5, %s930_s9 }
  0x32   : > { %p718_p2 = por %p717_p0, %p716_p12 }
  0x33   : > { %p714_p8 = pneg %p713_p11 }
  0x34   : > { %p720_p4 = por %p719_p3, %p718_p2 }
  0x36   : > { %p721_p1 = pnand %p720_p4, %p714_p8 }
  0x38   : > { %724 = shalt.err (!%p721_p1)
}
  0x39   : > { %s725_s25 = scalar_lea.vmem %s211_s11, 32  ;;  %s797_s22 = smov [#allocation6]  }
  0x3a   : > { %p726_p5 = scmp.ne.s32.totalorder %s211_s11, %s725_s25  ;;  %s730_s26 = sshll.u32 %s797_s22, 4  ;;  %s731_s26 = int_to_ptr.vmem [resolvable:$false] %s730_s26 }
  0x3b   : > { %s732_s28 = scalar_lea.vmem %s731_s26, 64  ;;  %p733_p7 = scmp.lt.s32.totalorder %s211_s11, %s731_s26 }
  0x3c   : > { %p728_p10 = pnand %p726_p5, %p682_p13  ;;  %p734_p6 = scmp.lt.s32.totalorder %s732_s28, %s725_s25 }
  0x3e   : > { %p729_p11 = pneg %p728_p10  ;;  %p735_p0 = por %p734_p6, %p733_p7 }
  0x40   : > { %p736_p12 = pnand %p735_p0, %p729_p11 }
  0x42   : > { %739 = shalt.err (!%p736_p12)
}
  0x43   : > { %621 = dma.hbm_to_vmem [thread:$0]  (!%p883_p9), %s930_s9, 32, %s211_s11, %s196_s30  }
  0x44   : > { %p1037_p8 = scmp.ne.s32.totalorder %s1036_s27, 0 }
  0x45   : > { %s221_s29 = sand.u32 (!%p1037_p8), 1, %s778_s13   ;;  %p1038_p13 = scmp.ne.s32.totalorder (!%p1037_p8), %s1032_s23, 0 }
  0x46   : > { %219 = sbr.rel (%p1037_p8) target bundleno = 376 (0x178), region = 28  ;;  %s601_s4 = sshll.u32 (!%p1037_p8), %s221_s29, 3 }
  0x47   : > { %s222_s8 = scalar_lea.sflag (!%p1037_p8), [#allocation5], %s221_s29  ;;  %s225_s10 = scalar_lea.vmem (!%p1037_p8), [#allocation4], %s601_s4 }
  0x4d   : > { %765 = dma.done.wait (%p1038_p13), %s222_s8, 128  }
  0x4e   : > { %767 = vsyncadd (%p1038_p13), %s222_s8, 4294967168  ;;  %s602_s5 = sshll.u32 %s221_s29, 1  ;;  %s231_s7 = scalar_lea.sflag [#allocation7], %s221_s29 }
  0x4f   : > { %s234_s6 = scalar_lea.vmem [#allocation6], %s602_s5 }
  0x50   : > { %769 = dma.done.wait (%p1038_p13), %s231_s7, 32  }
  0x51   : > { %771 = vsyncadd (%p1038_p13), %s231_s7, 4294967264  ;;  %v283_v0 = vlaneseq  ;;  %v798_v2 = vmov 0.0   ;;  %vm306_vm1 = vcmask 1043456   ;;  %v289_v3 = vld [vmem:[%s225_s10] sm:$0xff]  ;;  %v971_v4 = vld [vmem:[%s234_s6] sm:$0x3] }
  0x52   : > { %v304_v5 = vcombine.high %v289_v3, %v289_v3  ;;  %v307_v6 = vsel %vm306_vm1, %v289_v3, -inf  ;;  %vm370_vm2 = vcmp.ne.s32.totalorder %v971_v4, 4294967196  ;;  %v799_v62 = vmov 1966171168   ;;  %p270_p7 = scmp.lt.s32.totalorder %s786_s15, 1 }
  0x53   : > { %vm963_vm0 = vcmp.lt.s32.totalorder %v283_v0, 256  ;;  %v308_v7 = vrot.slane %v307_v6, 4  ;;  %v398_v10 = vsel %vm370_vm2, 1.0, %v798_v2  ;;  %v292_v22 = vshrl.u32 %v283_v0, 7 }
  0x54   : > { %287 = vst.msk [vmem:[#allocation2] sm:$0x3] %vm963_vm0, %v798_v2  ;;  %288 = vst.msk [vmem:[#allocation3] sm:$0x3] %vm963_vm0, %v798_v2  ;;  %v314_v8 = vsel %vm306_vm1, %v304_v5, -inf  ;;  %v376_v63 = vunpack.c.l.s4 %v799_v62  ;;  %vm416_vm5 = vcmask 1040384  }
  0x55   : > { %v309_v11 = vmax.f32 %v307_v6, %v308_v7  ;;  %v315_v12 = vrot.slane %v314_v8, 4  ;;  %v980_v25 = vsub.s32 0, %v292_v22  ;;  %v982_v27 = vsub.s32 1, %v292_v22  ;;  %s1049_s15 = smov (!%p270_p7, %s786_s15), 1 }
  0x56   : > { %v377_v6 = vunpack.c.0.s8 %v376_v63  ;;  %s272_s9 = scalar_lea.vmem %s1028_s2, %s1049_s15  ;;  %vm430_vm6 = vcmask 0   ;;  %s277_s18 = scalar_lea.vmem %s1029_s3, %s1049_s15 }
  0x57   : > { %v310_v14 = vrot.slane %v309_v11, 2  ;;  %v316_v15 = vmax.f32 %v314_v8, %v315_v12  ;;  %v296_v29 = vrot.slane %v971_v4, %v980_v25  ;;  %v300_v30 = vrot.slane %v971_v4, %v982_v27 }
  0x59   : > { %v311_v16 = vmax.f32 %v309_v11, %v310_v14  ;;  %v317_v17 = vrot.slane %v316_v15, 2  ;;  %vm301_vm3 = vcmp.eq.s32.totalorder %v292_v22, %v296_v29  ;;  %vm302_vm4 = vcmp.eq.s32.totalorder %v292_v22, %v300_v30 }
  0x5a   : > { %v380_v11 = vsub.s32 %v377_v6, %v292_v22 }
  0x5b   : > { %v397_v9 = vld [vmem:[#allocation3] sm:$0x3]  ;;  %v312_v18 = vrot.slane %v311_v16, 1  ;;  %v318_v19 = vmax.f32 %v316_v15, %v317_v17  ;;  %v371_v14 = vld [vmem:[#allocation2] sm:$0x3] }
  0x5c   : > { %v399_v13 = vadd.f32 %v398_v10, %v397_v9 }
  0x5d   : > { %v313_v20 = vmax.f32 %v311_v16, %v312_v18  ;;  %v319_v21 = vrot.slane %v318_v19, 1 }
  0x5e   : > { %400 = vst.msk [vmem:[#allocation3] sm:$0x3] %vm963_vm0, %v399_v13 }
  0x5f   : > { %v320_v23 = vmax.f32 %v318_v19, %v319_v21 }
  0x61   : > { %v323_v24 = vcombine.low %v313_v20, %v320_v23 }
  0x63   : > { %v325_v26 = vsub.f32 %v289_v3, %v323_v24 }
  0x65   : > { %v326_v28 = vmul.f32 1.442695, %v325_v26  ;;  %v350_v31 = vcombine.high %v325_v26, %v325_v26  ;;  %v352_v32 = vsel %vm301_vm3, %v325_v26, 0.0  ;;  %v432_v18 = vld [vmem:[#allocation3] sm:$0x3] }
  0x66   : > { %v354_v35 = vsel %vm306_vm1, %v352_v32, 0.0  ;;  %v437_v19 = vrot.slane %v432_v18, %v980_v25  ;;  %v441_v20 = vrot.slane %v432_v18, %v982_v27 }
  0x67   : > { %674 = vpow2.f32 %v326_v28  ;;  %v353_v33 = vsel %vm302_vm4, %v350_v31, 0.0  ;;  %v355_v41 = vrot.slane %v354_v35, 4 }
  0x68   : > { %v361_v39 = vsel %vm306_vm1, %v353_v33, 0.0  ;;  %v444_v28 = vsel %vm416_vm5, %v437_v19, 0.0  ;;  %v445_v4 = vsel %vm416_vm5, %v441_v20, 0.0 }
  0x69   : > { %v362_v44 = vrot.slane %v361_v39, 4  ;;  %v356_v47 = vadd.f32 %v355_v41, %v354_v35  ;;  %v446_v30 = vadd.f32 %v445_v4, %v444_v28 }
  0x6b   : > { %v363_v50 = vadd.f32 %v362_v44, %v361_v39  ;;  %v357_v53 = vrot.slane %v356_v47, 2 }
  0x6d   : > { %v364_v56 = vrot.slane %v363_v50, 2  ;;  %v358_v58 = vadd.f32 %v357_v53, %v356_v47 }
  0x6f   : > { %v365_v59 = vadd.f32 %v364_v56, %v363_v50  ;;  %v359_v60 = vrot.slane %v358_v58, 1 }
  0x71   : > { %v675_v34 = vpop.eup %674  ;;  %v366_v61 = vrot.slane %v365_v59, 1  ;;  %v360_v0 = vadd.f32 %v359_v60, %v358_v58 }
  0x72   : > { %v329_v36 = vcombine.high %v675_v34, %v675_v34  ;;  %v331_v37 = vsel %vm306_vm1, %v675_v34, 0.0 }
  0x73   : > { %v332_v38 = vrot.slane %v331_v37, 4  ;;  %v367_v5 = vadd.f32 %v366_v61, %v365_v59 }
  0x74   : > { %v338_v40 = vsel %vm306_vm1, %v329_v36, 0.0 }
  0x75   : > { %v333_v42 = vadd.f32 %v332_v38, %v331_v37  ;;  %v339_v43 = vrot.slane %v338_v40, 4 }
  0x77   : > { %v334_v45 = vrot.slane %v333_v42, 2  ;;  %v340_v46 = vadd.f32 %v339_v43, %v338_v40 }
  0x79   : > { %v335_v48 = vadd.f32 %v334_v45, %v333_v42  ;;  %v341_v49 = vrot.slane %v340_v46, 2 }
  0x7b   : > { %v336_v51 = vrot.slane %v335_v48, 1  ;;  %v342_v52 = vadd.f32 %v341_v49, %v340_v46 }
  0x7d   : > { %v337_v54 = vadd.f32 %v336_v51, %v335_v48  ;;  %v343_v55 = vrot.slane %v342_v52, 1 }
  0x7f   : > { %v344_v57 = vadd.f32 %v343_v55, %v342_v52  ;;  %676 = vlog2.f32 %v337_v54 }
  0x81   : > { %678 = vlog2.f32 %v344_v57 }
  0x89   : > { %v677_v2 = vpop.eup %676 }
  0x8a   : > { %v346_v3 = vmul.f32 0.6931472, %v677_v2 }
  0x8b   : > { %v679_v7 = vpop.eup %678 }
  0x8c   : > { %v348_v8 = vmul.f32 0.6931472, %v679_v7  ;;  %v368_v9 = vsub.f32 %v346_v3, %v360_v0 }
  0x8e   : > { %v369_v10 = vsub.f32 %v348_v8, %v367_v5 }
  0x90   : > { %v374_v12 = vcombine.low %v368_v9, %v369_v10 }
  0x92   : > { %v381_v13 = vrot.slane %v374_v12, %v380_v11 }
  0x94   : > { %v388_v15 = vrot.slane %v381_v13, %v380_v11 }
  0x96   : > { %v390_v16 = vsel %vm370_vm2, %v388_v15, 0.0 }
  0x97   : > { %v391_v17 = vadd.f32 %v390_v16, %v371_v14 }
  0x99   : > { %396 = vst.msk [vmem:[#allocation2] sm:$0x3] %vm963_vm0, %v391_v17 }
  0xa0   : > { %v404_v21 = vld [vmem:[#allocation2] sm:$0x3] }
  0xa1   : > { %v409_v22 = vrot.slane %v404_v21, %v980_v25  ;;  %v413_v23 = vrot.slane %v404_v21, %v982_v27 }
  0xa3   : > { %v417_v24 = vsel %vm416_vm5, %v409_v22, 0.0  ;;  %v418_v26 = vsel %vm416_vm5, %v413_v23, 0.0 }
  0xa4   : > { %v419_v29 = vadd.f32 %v418_v26, %v417_v24 }
  0xa6   : > { %420 = vadd.xlane.f32.xlu0 %v419_v29 }
  0xaa   : > { %447 = vadd.xlane.f32.xlu0 %v446_v30 }
 0x133   : > { %v421_v1 = vpop.xlane.xlu0 %420 }
 0x134   : > { %v422_v31 = vrot.slane %v421_v1, 4 }
 0x136   : > { %v423_v32 = vadd.f32 %v422_v31, %v421_v1 }
 0x137   : > { %v448_v33 = vpop.xlane.xlu0 %447 }
 0x138   : > { %v424_v34 = vrot.slane %v423_v32, 2  ;;  %v449_v35 = vrot.slane %v448_v33, 4 }
 0x13a   : > { %v450_v36 = vadd.f32 %v449_v35, %v448_v33  ;;  %v425_v25 = vadd.f32 %v424_v34, %v423_v32 }
 0x13c   : > { %v451_v37 = vrot.slane %v450_v36, 2  ;;  %v426_v27 = vrot.slane %v425_v25, 1 }
 0x13e   : > { %v452_v38 = vadd.f32 %v451_v37, %v450_v36  ;;  %v427_v39 = vadd.f32 %v426_v27, %v425_v25 }
 0x140   : > { %607 = vpush %v427_v39  ;;  %v453_v40 = vrot.slane %v452_v38, 1 }
 0x142   : > { %v454_v41 = vadd.f32 %v453_v40, %v452_v38 }
 0x144   : > { %609 = vpush %v454_v41 }
 0x171   : > { %s608_s11 = spop %607 }
 0x172   : > { %v429_v42 = vstv %s608_s11 }
 0x173   : > { %431 = vst.msk [vmem:[%s272_s9] sm:$0x1] %vm430_vm6, %v429_v42 }
 0x175   : > { %s610_s20 = spop %609 }
 0x176   : > { %v456_v43 = vstv %s610_s20 }
 0x177   : > { %457 = vst.msk [vmem:[%s277_s18] sm:$0x1] %vm430_vm6, %v456_v43 }
 0x178 PF: > { %s20_s17 = sadd.s32 1, %s794_s17   ;;  %s1041_s12 = smov %s778_s13 }
 0x179   : > { %p17_p9 = scmp.ge.s32.totalorder %s20_s17, 4   ;;  %s1042_s13 = smov %s782_s14 }
 0x17a   : > { %s1043_s14 = smov %s869_s24  ;;  %s1044_s15 = smov %s790_s16 }
 0x17b   : > { %s1045_s16 = smov %s1047_s19  ;;  %19 = sbr.rel (!%p17_p9) target bundleno = 6 (0x6), region = 101 }
 0x182   :  { %493 = vsyncpa [#allocation5], 1 }
 0x183   :  { %495 = vsyncpa [#allocation5 + $0x1], 1 }
 0x184   :  { %496 = vsyncpa [#allocation7], 1 }
 0x185   :  { %498 = vsyncpa [#allocation7 + $0x1], 1 }

</bundles_post_ra>
